<compile_context>
chip_gen: v7x
topology: tpu7x:2x2x1
jax: 0.10.0
libtpu: 0.0.40
codegen_flags: <defaults>
</compile_context>

<pallas_src>
import functools

import jax
import jax.numpy as jnp
from jax.experimental import pallas as pl
from jax.experimental.pallas import tpu as pltpu


HEAD_PAD = 128  # lane-dense fused head width: [ policy (A) | value (1) | zero pad ]


def _round_up(n, m):
    return ((n + m - 1) // m) * m


def _vmem_limit_bytes():
    """~3/4 of physical VMEM per generation (96 MiB on v5e/v6e, 48 MiB on v7x);
    conservative 32 MiB fallback if the hardware query is unavailable."""
    try:
        cap = int(pltpu.get_tpu_info().vmem_capacity_bytes)
        return max(32 * 1024 * 1024, min((cap * 3) // 4, 96 * 1024 * 1024))
    except Exception:
        return 32 * 1024 * 1024


def actor_critic_kernel(x_ref, w1_ref, b1_ref, w2_ref, b2_ref, wh_ref, bh_ref,
                        out_ref, *, action_dim):
    # x tile arrives as f32 (no wrapper-side cast pass); cast to bf16 in-kernel
    # right before the MXU.  All elementwise math stays f32 (v5e has no bf16 VPU).
    x = x_ref[...].astype(jnp.bfloat16)

    # shared_layer1 + relu  (relu + bf16 cast folded: one live narrow copy)
    h1 = jnp.dot(x, w1_ref[...], preferred_element_type=jnp.float32) + b1_ref[...]
    h1 = jnp.maximum(h1, 0.0).astype(jnp.bfloat16)

    # shared_layer2 + relu
    h2 = jnp.dot(h1, w2_ref[...], preferred_element_type=jnp.float32) + b2_ref[...]
    h2 = jnp.maximum(h2, 0.0).astype(jnp.bfloat16)

    # fused policy+value head -> (TILE_B, HEAD_PAD), f32 accumulation
    ho = jnp.dot(h2, wh_ref[...], preferred_element_type=jnp.float32) + bh_ref[...]

    # numerically-stable softmax over the first `action_dim` lanes only
    lane = jax.lax.broadcasted_iota(jnp.int32, ho.shape, 1)
    is_policy = lane < action_dim
    logits = jnp.where(is_policy, ho, -jnp.inf)
    m = jnp.max(logits, axis=-1, keepdims=True)
    e = jnp.where(is_policy, jnp.exp(logits - m), 0.0)
    # approx reciprocal -> EUP slot (free); rows sum to 1 only to ~1e-3
    inv_denom = pl.reciprocal(jnp.sum(e, axis=-1, keepdims=True), approx=True)
    p = e * inv_denom

    # lane-dense output slab: lanes [0, A) = policy, lane A = value, rest = 0.
    # Stored as bf16 to halve the dominant HBM writeback.
    out_ref[...] = jnp.where(lane == action_dim, ho, p).astype(out_ref.dtype)


def prepare_params(p, action_dim):
    """One-time packing (outside the hot path): fuse+pad the two heads, cast
    matmul weights to bf16, keep biases in f32."""
    assert action_dim >= 1, "need at least one action for a finite softmax max"
    hidden = p["w1"].shape[1]
    assert action_dim + 1 <= HEAD_PAD, "fused head requires action_dim + 1 <= 128"
    wh = jnp.zeros((hidden, HEAD_PAD), jnp.float32)
    wh = wh.at[:, :action_dim].set(p["wp"])
    wh = wh.at[:, action_dim:action_dim + 1].set(p["wv"])
    bh = jnp.zeros((1, HEAD_PAD), jnp.float32)
    bh = bh.at[:, :action_dim].set(p["bp"])
    bh = bh.at[:, action_dim:action_dim + 1].set(p["bv"])
    return {
        "w1": p["w1"].astype(jnp.bfloat16), "b1": p["b1"],
        "w2": p["w2"].astype(jnp.bfloat16), "b2": p["b2"],
        "wh": wh.astype(jnp.bfloat16),      "bh": bh,
    }


def actor_critic_forward(x, kp, *, action_dim, tile_b=1024):
    """pallas_call wrapper: grid over batch, weights resident across iterations."""
    B, input_dim = x.shape
    hidden = kp["w1"].shape[1]
    assert 1 <= action_dim <= HEAD_PAD - 1

    # Batch tile: multiple of 16 (bf16 sublane packing of the output slab).
    if B <= 16:
        # single exact block: block dims equal the full array dims
        tb = B
    else:
        tb = min(_round_up(tile_b, 16), _round_up(B, 16))
        if pl.cdiv(B, tb) < 2:
            # guarantee >= 2 grid steps so the "parallel" axis can shard across
            # v7x's two TensorCores (harmless on single-TC v5e/v6e)
            tb = _round_up(pl.cdiv(B, 2), 16)
    grid = (pl.cdiv(B, tb),)   # ragged trailing block handled by the pipeline

    flops = 2 * B * (input_dim * hidden + hidden * hidden + hidden * HEAD_PAD)
    bytes_accessed = (
        B * input_dim * 4                                                   # x (f32)
        + (input_dim * hidden + hidden * hidden + hidden * HEAD_PAD) * 2    # weights
        + (2 * hidden + HEAD_PAD) * 4                                       # biases
        + B * HEAD_PAD * 2)                                                 # out (bf16)
    cost = pl.CostEstimate(flops=flops, transcendentals=B * HEAD_PAD,
                           bytes_accessed=bytes_accessed)

    kernel = functools.partial(actor_critic_kernel, action_dim=action_dim)
    out = pl.pallas_call(
        kernel,
        out_shape=jax.ShapeDtypeStruct((B, HEAD_PAD), jnp.bfloat16),
        grid_spec=pltpu.PrefetchScalarGridSpec(
            num_scalar_prefetch=0,
            grid=grid,
            in_specs=[
                pl.BlockSpec((tb, input_dim), lambda i: (i, 0)),      # x: batch-tiled
                pl.BlockSpec((input_dim, hidden), lambda i: (0, 0)),  # w1: resident
                pl.BlockSpec((1, hidden), lambda i: (0, 0)),          # b1: resident
                pl.BlockSpec((hidden, hidden), lambda i: (0, 0)),     # w2: resident
                pl.BlockSpec((1, hidden), lambda i: (0, 0)),          # b2: resident
                pl.BlockSpec((hidden, HEAD_PAD), lambda i: (0, 0)),   # fused head W
                pl.BlockSpec((1, HEAD_PAD), lambda i: (0, 0)),        # fused head b
            ],
            out_specs=pl.BlockSpec((tb, HEAD_PAD), lambda i: (i, 0)),
        ),
        compiler_params=pltpu.CompilerParams(
            dimension_semantics=("parallel",),        # megacore sharding on v7x
            vmem_limit_bytes=_vmem_limit_bytes(),     # per-generation VMEM budget
        ),
        cost_estimate=cost,
    )(x, kp["w1"], kp["b1"], kp["w2"], kp["b2"], kp["wh"], kp["bh"])

    policy = out[:, :action_dim].astype(jnp.float32)
    value = out[:, action_dim:action_dim + 1].astype(jnp.float32)
    return policy, value


def init_params(key, input_dim, action_dim, hidden=128):
    """Deterministic synthetic init (PyTorch-Linear-like uniform fan-in scaling)."""
    ks = jax.random.split(key, 8)

    def linear(kw, kb, fan_in, fan_out):
        bound = 1.0 / jnp.sqrt(fan_in)
        w = jax.random.uniform(kw, (fan_in, fan_out), jnp.float32, -bound, bound)
        b = jax.random.uniform(kb, (1, fan_out), jnp.float32, -bound, bound)
        return w, b

    w1, b1 = linear(ks[0], ks[1], input_dim, hidden)
    w2, b2 = linear(ks[2], ks[3], hidden, hidden)
    wp, bp = linear(ks[4], ks[5], hidden, action_dim)
    wv, bv = linear(ks[6], ks[7], hidden, 1)
    return {"w1": w1, "b1": b1, "w2": w2, "b2": b2,
            "wp": wp, "bp": bp, "wv": wv, "bv": bv}


def reference_forward_f32(x, p):
    h1 = jax.nn.relu(x @ p["w1"] + p["b1"])
    h2 = jax.nn.relu(h1 @ p["w2"] + p["b2"])
    return jax.nn.softmax(h2 @ p["wp"] + p["bp"], axis=-1), h2 @ p["wv"] + p["bv"]


def reference_forward_bf16(x, p):
    """Reference mirroring the kernel's dtype strategy (bf16 operands, f32 accum)."""
    bf = jnp.bfloat16
    dot = lambda a, b: jnp.dot(a.astype(bf), b.astype(bf),
                               preferred_element_type=jnp.float32)
    h1 = jax.nn.relu(dot(x, p["w1"]) + p["b1"])
    h2 = jax.nn.relu(dot(h1, p["w2"]) + p["b2"])
    return jax.nn.softmax(dot(h2, p["wp"]) + p["bp"], axis=-1), dot(h2, p["wv"]) + p["bv"]


if __name__ == "__main__":
    key = jax.random.PRNGKey(0)
    k_x, k_x2, k_p = jax.random.split(key, 3)

    B, input_dim, action_dim = 2, 16, 8
    x = jax.random.normal(k_x, (B, input_dim), jnp.float32)
    params = init_params(k_p, input_dim, action_dim)
    kparams = prepare_params(params, action_dim)

    fwd = jax.jit(functools.partial(actor_critic_forward, action_dim=action_dim))
    policy, value = fwd(x, kparams)
    jax.block_until_ready((policy, value))

    def check(x_in, pol, val):
        ref_p_bf, ref_v_bf = reference_forward_bf16(x_in, params)
        ref_p_f32, ref_v_f32 = reference_forward_f32(x_in, params)
        assert pol.shape == (x_in.shape[0], action_dim)
        assert val.shape == (x_in.shape[0], 1)
        # matches a reference with the same bf16-operand / f32-accum strategy
        # (tolerances cover the bf16 output store + approx reciprocal)
        assert jnp.allclose(pol, ref_p_bf, atol=1e-2, rtol=1e-2)
        assert jnp.allclose(val, ref_v_bf, atol=1e-2, rtol=1e-2)
        # and stays close to the pure-f32 PyTorch-equivalent semantics
        assert jnp.allclose(pol, ref_p_f32, atol=5e-2, rtol=5e-2)
        assert jnp.allclose(val, ref_v_f32, atol=5e-2, rtol=5e-2)
        # softmax rows sum to 1 to ~1e-2 (bf16 output + approx=True reciprocal)
        assert jnp.allclose(jnp.sum(pol, axis=-1), 1.0, atol=2e-2)

    check(x, policy, value)

    # Exercise the multi-step grid (megacore split) + ragged trailing block path:
    # B=40 at the default tile -> tb=32, grid=(2,), last block has 8 valid rows.
    B2 = 40
    x2 = jax.random.normal(k_x2, (B2, input_dim), jnp.float32)
    policy2, value2 = fwd(x2, kparams)
    jax.block_until_ready((policy2, value2))
    check(x2, policy2, value2)

    print("KERNEL_OK")
</pallas_src>

<mosaic_0001>
module attributes {stable_mosaic.version = 11 : i64} {
  func.func @actor_critic_kernel(%arg0: i32, %arg1: memref<2x16xf32, #tpu.memory_space<vmem>>, %arg2: memref<16x128xbf16, #tpu.memory_space<vmem>>, %arg3: memref<1x128xf32, #tpu.memory_space<vmem>>, %arg4: memref<128x128xbf16, #tpu.memory_space<vmem>>, %arg5: memref<1x128xf32, #tpu.memory_space<vmem>>, %arg6: memref<128x128xbf16, #tpu.memory_space<vmem>>, %arg7: memref<1x128xf32, #tpu.memory_space<vmem>>, %arg8: memref<2x128xbf16, #tpu.memory_space<vmem>>) attributes {dimension_semantics = [#tpu.dimension_semantics<parallel>], iteration_bounds = array<i64: 1>, scalar_prefetch = 0 : i64, scratch_operands = 0 : i64, tpu.core_type = #tpu.core_type<tc>, window_params = [{transform_indices = @transform_0, window_bounds = array<i64: 2, 16>}, {pipeline_mode = #tpu.pipeline_mode<synchronous>, transform_indices = @transform_1, window_bounds = array<i64: 16, 128>}, {pipeline_mode = #tpu.pipeline_mode<synchronous>, transform_indices = @transform_2, window_bounds = array<i64: 1, 128>}, {pipeline_mode = #tpu.pipeline_mode<synchronous>, transform_indices = @transform_3, window_bounds = array<i64: 128, 128>}, {pipeline_mode = #tpu.pipeline_mode<synchronous>, transform_indices = @transform_4, window_bounds = array<i64: 1, 128>}, {pipeline_mode = #tpu.pipeline_mode<synchronous>, transform_indices = @transform_5, window_bounds = array<i64: 128, 128>}, {pipeline_mode = #tpu.pipeline_mode<synchronous>, transform_indices = @transform_6, window_bounds = array<i64: 1, 128>}, {transform_indices = @transform_7, window_bounds = array<i64: 2, 128>}]} {
    %c0 = arith.constant 0 : index
    %c0_0 = arith.constant 0 : index
    %0 = vector.load %arg1[%c0, %c0_0] : memref<2x16xf32, #tpu.memory_space<vmem>>, vector<2x16xf32>
    %1 = arith.truncf %0 : vector<2x16xf32> to vector<2x16xbf16>
    %c0_1 = arith.constant 0 : index
    %c0_2 = arith.constant 0 : index
    %2 = vector.load %arg2[%c0_1, %c0_2] : memref<16x128xbf16, #tpu.memory_space<vmem>>, vector<16x128xbf16>
    %cst = arith.constant dense<0.000000e+00> : vector<2x128xf32>
    %3 = tpu.matmul %1, %2, %cst {dimension_numbers = #tpu.dot_dimension_numbers<[1], [0], [0], [1], [0, 0, 1, 1], [], []>} : vector<2x16xbf16>, vector<16x128xbf16>, vector<2x128xf32> -> vector<2x128xf32>
    %c0_3 = arith.constant 0 : index
    %c0_4 = arith.constant 0 : index
    %4 = vector.load %arg3[%c0_3, %c0_4] : memref<1x128xf32, #tpu.memory_space<vmem>>, vector<1x128xf32>
    %5 = vector.broadcast %4 : vector<1x128xf32> to vector<2x128xf32>
    %6 = arith.addf %3, %5 : vector<2x128xf32>
    %cst_5 = arith.constant 0.000000e+00 : f32
    %7 = vector.broadcast %cst_5 : f32 to vector<2x128xf32>
    %8 = arith.maximumf %6, %7 : vector<2x128xf32>
    %9 = arith.truncf %8 : vector<2x128xf32> to vector<2x128xbf16>
    %c0_6 = arith.constant 0 : index
    %c0_7 = arith.constant 0 : index
    %10 = vector.load %arg4[%c0_6, %c0_7] : memref<128x128xbf16, #tpu.memory_space<vmem>>, vector<128x128xbf16>
    %cst_8 = arith.constant dense<0.000000e+00> : vector<2x128xf32>
    %11 = tpu.matmul %9, %10, %cst_8 {dimension_numbers = #tpu.dot_dimension_numbers<[1], [0], [0], [1], [0, 0, 1, 1], [], []>} : vector<2x128xbf16>, vector<128x128xbf16>, vector<2x128xf32> -> vector<2x128xf32>
    %c0_9 = arith.constant 0 : index
    %c0_10 = arith.constant 0 : index
    %12 = vector.load %arg5[%c0_9, %c0_10] : memref<1x128xf32, #tpu.memory_space<vmem>>, vector<1x128xf32>
    %13 = vector.broadcast %12 : vector<1x128xf32> to vector<2x128xf32>
    %14 = arith.addf %11, %13 : vector<2x128xf32>
    %cst_11 = arith.constant 0.000000e+00 : f32
    %15 = vector.broadcast %cst_11 : f32 to vector<2x128xf32>
    %16 = arith.maximumf %14, %15 : vector<2x128xf32>
    %17 = arith.truncf %16 : vector<2x128xf32> to vector<2x128xbf16>
    %c0_12 = arith.constant 0 : index
    %c0_13 = arith.constant 0 : index
    %18 = vector.load %arg6[%c0_12, %c0_13] : memref<128x128xbf16, #tpu.memory_space<vmem>>, vector<128x128xbf16>
    %cst_14 = arith.constant dense<0.000000e+00> : vector<2x128xf32>
    %19 = tpu.matmul %17, %18, %cst_14 {dimension_numbers = #tpu.dot_dimension_numbers<[1], [0], [0], [1], [0, 0, 1, 1], [], []>} : vector<2x128xbf16>, vector<128x128xbf16>, vector<2x128xf32> -> vector<2x128xf32>
    %c0_15 = arith.constant 0 : index
    %c0_16 = arith.constant 0 : index
    %20 = vector.load %arg7[%c0_15, %c0_16] : memref<1x128xf32, #tpu.memory_space<vmem>>, vector<1x128xf32>
    %21 = vector.broadcast %20 : vector<1x128xf32> to vector<2x128xf32>
    %22 = arith.addf %19, %21 : vector<2x128xf32>
    %23 = tpu.iota {dimensions = array<i32: 1>} : vector<2x128xi32>
    %c8_i32 = arith.constant 8 : i32
    %24 = vector.broadcast %c8_i32 : i32 to vector<2x128xi32>
    %25 = arith.cmpi slt, %23, %24 : vector<2x128xi32>
    %cst_17 = arith.constant 0xFF800000 : f32
    %26 = vector.broadcast %cst_17 : f32 to vector<2x128xf32>
    %27 = arith.select %25, %22, %26 : vector<2x128xi1>, vector<2x128xf32>
    %cst_18 = arith.constant dense<0xFF800000> : vector<2xf32>
    %28 = vector.multi_reduction <maximumf>, %27, %cst_18 [1] : vector<2x128xf32> to vector<2xf32>
    %29 = vector.shape_cast %28 : vector<2xf32> to vector<2x1xf32>
    %30 = vector.broadcast %29 : vector<2x1xf32> to vector<2x128xf32>
    %31 = arith.subf %27, %30 : vector<2x128xf32>
    %32 = math.exp %31 : vector<2x128xf32>
    %cst_19 = arith.constant 0.000000e+00 : f32
    %33 = vector.broadcast %cst_19 : f32 to vector<2x128xf32>
    %34 = arith.select %25, %32, %33 : vector<2x128xi1>, vector<2x128xf32>
    %cst_20 = arith.constant dense<0.000000e+00> : vector<2xf32>
    %35 = vector.multi_reduction <add>, %34, %cst_20 [1] : vector<2x128xf32> to vector<2xf32>
    %36 = vector.shape_cast %35 : vector<2xf32> to vector<2x1xf32>
    %37 = tpu.reciprocal %36 {approx = true} : vector<2x1xf32> -> vector<2x1xf32>
    %38 = vector.broadcast %37 : vector<2x1xf32> to vector<2x128xf32>
    %39 = arith.mulf %34, %38 : vector<2x128xf32>
    %c8_i32_21 = arith.constant 8 : i32
    %40 = vector.broadcast %c8_i32_21 : i32 to vector<2x128xi32>
    %41 = arith.cmpi eq, %23, %40 : vector<2x128xi32>
    %42 = arith.select %41, %22, %39 : vector<2x128xi1>, vector<2x128xf32>
    %43 = arith.truncf %42 : vector<2x128xf32> to vector<2x128xbf16>
    %c0_22 = arith.constant 0 : index
    %c0_23 = arith.constant 0 : index
    %44 = vector.load %arg8[%c0_22, %c0_23] : memref<2x128xbf16, #tpu.memory_space<vmem>>, vector<2x128xbf16>
    tpu.vector_store %arg8[%c0_22, %c0_23], %43 {strides = array<i32>} : memref<2x128xbf16, #tpu.memory_space<vmem>>, vector<2x128xbf16>,
    return
  }
  func.func @transform_0(%arg0: i32) -> (i32, i32) {
    %c0_i32 = arith.constant 0 : i32
    %c0_i32_0 = arith.constant 0 : i32
    return %arg0, %c0_i32 : i32, i32
  }
  func.func @transform_1(%arg0: i32) -> (i32, i32) {
    %c0_i32 = arith.constant 0 : i32
    %c0_i32_0 = arith.constant 0 : i32
    %c0_i32_1 = arith.constant 0 : i32
    return %c0_i32, %c0_i32_0 : i32, i32
  }
  func.func @transform_2(%arg0: i32) -> (i32, i32) {
    %c0_i32 = arith.constant 0 : i32
    %c0_i32_0 = arith.constant 0 : i32
    %c0_i32_1 = arith.constant 0 : i32
    return %c0_i32, %c0_i32_0 : i32, i32
  }
  func.func @transform_3(%arg0: i32) -> (i32, i32) {
    %c0_i32 = arith.constant 0 : i32
    %c0_i32_0 = arith.constant 0 : i32
    %c0_i32_1 = arith.constant 0 : i32
    return %c0_i32, %c0_i32_0 : i32, i32
  }
  func.func @transform_4(%arg0: i32) -> (i32, i32) {
    %c0_i32 = arith.constant 0 : i32
    %c0_i32_0 = arith.constant 0 : i32
    %c0_i32_1 = arith.constant 0 : i32
    return %c0_i32, %c0_i32_0 : i32, i32
  }
  func.func @transform_5(%arg0: i32) -> (i32, i32) {
    %c0_i32 = arith.constant 0 : i32
    %c0_i32_0 = arith.constant 0 : i32
    %c0_i32_1 = arith.constant 0 : i32
    return %c0_i32, %c0_i32_0 : i32, i32
  }
  func.func @transform_6(%arg0: i32) -> (i32, i32) {
    %c0_i32 = arith.constant 0 : i32
    %c0_i32_0 = arith.constant 0 : i32
    %c0_i32_1 = arith.constant 0 : i32
    return %c0_i32, %c0_i32_0 : i32, i32
  }
  func.func @transform_7(%arg0: i32) -> (i32, i32) {
    %c0_i32 = arith.constant 0 : i32
    %c0_i32_0 = arith.constant 0 : i32
    return %arg0, %c0_i32 : i32, i32
  }
}

</mosaic_0001>

<bundles_post_ra>
// kernel: actor_critic_forward.1
= control target key start
LH: loop header
LB: loop body
LE: loop exit
PB: predicated region body
PF: predicated region fallthrough
CT: control target
= control target key end

     0   :  { %12 = vsyncpa [#allocation3], 0  ;;  %s689_s0 = inlined_call_operand.hbm [shape: f32[2,16], index: 0, kind: input, shape index: {}]   ;;  %s690_s1 = inlined_call_operand.vmem [shape: bf16[16,128], index: 1, kind: input, shape index: {}]   ;;  %s691_s2 = inlined_call_operand.vmem [shape: f32[1,128], index: 2, kind: input, shape index: {}]   ;;  %s692_s3 = inlined_call_operand.hbm [shape: bf16[128,128], index: 3, kind: input, shape index: {}]   ;;  %s693_s4 = inlined_call_operand.vmem [shape: f32[1,128], index: 4, kind: input, shape index: {}]   ;;  %s694_s5 = inlined_call_operand.hbm [shape: bf16[128,128], index: 5, kind: input, shape index: {}]   ;;  %s695_s6 = inlined_call_operand.vmem [shape: f32[1,128], index: 6, kind: input, shape index: {}]   ;;  %s696_s7 = inlined_call_operand.vmem [shape: bf16[2,128], index: 7, kind: output, shape index: {}]  }
   0x1   :  { %13 = vsyncpa [#allocation5], 0  ;;  %s565_s24 = smov [#allocation4]   ;;  %s495_s28 = scalar_lea.hbm %s692_s3, 1024 }
   0x2   :  { %s33_s25 = sshll.u32 %s565_s24, 4  ;;  %p496_p0 = scmp.ne.s32.totalorder %s692_s3, %s495_s28  ;;  %s34_s25 = int_to_ptr.vmem [resolvable:$true] %s33_s25 }
   0x3   :  { %p499_p1 = scmp.lt.u32.totalorder %s495_s28, %s692_s3 }
   0x5   :  { %p501_p2 = pnand %p499_p1, %p496_p0 }
   0x7   :  { %504 = shalt.err (!%p501_p2)
}
   0x8   :  { %s505_s10 = scalar_lea.vmem %s34_s25, 1024  ;;  %p510_p4 = scmp.lt.s32.totalorder %s34_s25, %s34_s25 }
   0x9   :  { %p506_p3 = scmp.ne.s32.totalorder %s34_s25, %s505_s10  ;;  %p511_p5 = scmp.lt.s32.totalorder %s505_s10, %s505_s10 }
   0xb   :  { %p512_p6 = por %p511_p5, %p510_p4 }
   0xd   :  { %p513_p7 = pnand %p512_p6, %p506_p3 }
   0xf   :  { %516 = shalt.err (!%p513_p7)
}
  0x10   :  { %s566_s11 = smov 64   ;;  %s567_s12 = smov 4  }
  0x11   :  { %39 = dma.hbm_to_vmem [thread:$0]  %s692_s3, 1024, %s34_s25, [#allocation5], %s566_s11, %s566_s11, %s567_s12  }
  0x12   :  { %s568_s15 = smov [#allocation2]   ;;  %s569_s17 = smov [#allocation6]  }
  0x13   :  { %s20_s16 = sshll.u32 %s568_s15, 4  ;;  %s47_s18 = sshll.u32 %s569_s17, 4  ;;  %s21_s16 = int_to_ptr.vmem [resolvable:$true] %s20_s16  ;;  %s48_s18 = int_to_ptr.vmem [resolvable:$true] %s47_s18 }
  0x14   :  { %s517_s21 = scalar_lea.hbm %s689_s0, 32 }
  0x15   :  { %p518_p8 = scmp.ne.s32.totalorder %s689_s0, %s517_s21  ;;  %p521_p9 = scmp.lt.u32.totalorder %s517_s21, %s689_s0 }
  0x17   :  { %p523_p10 = pnand %p521_p9, %p518_p8 }
  0x19   :  { %526 = shalt.err (!%p523_p10)
}
  0x1a   :  { %s527_s3 = scalar_lea.vmem %s21_s16, 32  ;;  %p532_p12 = scmp.lt.s32.totalorder %s21_s16, %s21_s16 }
  0x1b   :  { %p528_p11 = scmp.ne.s32.totalorder %s21_s16, %s527_s3  ;;  %p533_p13 = scmp.lt.s32.totalorder %s527_s3, %s527_s3 }
  0x1d   :  { %p534_p0 = por %p533_p13, %p532_p12 }
  0x1f   :  { %p535_p1 = pnand %p534_p0, %p528_p11 }
  0x21   :  { %538 = shalt.err (!%p535_p1)
}
  0x22   :  { %23 = dma.hbm_to_vmem [thread:$0]  %s689_s0, 32, %s21_s16, [#allocation3]  }
  0x23   :  { %s539_s30 = scalar_lea.hbm %s694_s5, 1024 }
  0x24   :  { %p540_p2 = scmp.ne.s32.totalorder %s694_s5, %s539_s30  ;;  %p543_p3 = scmp.lt.u32.totalorder %s539_s30, %s694_s5 }
  0x26   :  { %p545_p4 = pnand %p543_p3, %p540_p2 }
  0x28   :  { %548 = shalt.err (!%p545_p4)
}
  0x29   :  { %s549_s14 = scalar_lea.vmem %s48_s18, 1024  ;;  %p554_p6 = scmp.lt.s32.totalorder %s48_s18, %s48_s18 }
  0x2a   :  { %p550_p5 = scmp.ne.s32.totalorder %s48_s18, %s549_s14  ;;  %p555_p7 = scmp.lt.s32.totalorder %s549_s14, %s549_s14 }
  0x2c   :  { %p556_p8 = por %p555_p7, %p554_p6 }
  0x2e   :  { %p557_p9 = pnand %p556_p8, %p550_p5 }
  0x30   :  { %560 = shalt.err (!%p557_p9)
}
  0x31   :  { %53 = dma.hbm_to_vmem [thread:$0]  %s694_s5, 1024, %s48_s18, [#allocation5], %s566_s11, %s566_s11, %s567_s12  }
  0x32   :  { %561 = dma.done.wait [#allocation3], 32  }
  0x33   :  { %562 = vsyncadd [#allocation3], 4294967264 }
  0x34   :  { %563 = dma.done.wait [#allocation5], 2048  }
  0x35   :  { %564 = vsyncadd [#allocation5], 4294965248  ;;  %v570_v0 = vmov 0.0   ;;  %vm571_vm0 = vmmov 0   ;;  %v474_v1 = vld [vmem:[%s690_s1] sm:$0xff]   ;;  %vm83_vm1 = vcmask 130048   ;;  %v353_v36 = vlaneseq }
  0x36   :  { %421 = vmatprep.subr.bf16.mxu0 %v570_v0  ;;  %423 = vmatprep.mubr.msk.bf16.mxu0 %vm571_vm0, %v570_v0  ;;  %v66_v2 = vld [vmem:[#allocation2] sm:$0x3]  ;;  %v475_v4 = vld [vmem:[#allocation4] sm:$0xff]   ;;  %v476_v5 = vld [vmem:[#allocation4 + $0x8] sm:$0xff]   ;;  %vm357_vm3 = vcmask 1041408  }
  0x37   :  { %427 = vmatprep.subr.bf16.mxu1 %v570_v0  ;;  %443 = vmatprep.mubr.msk.bf16.mxu1 %vm571_vm0, %v570_v0  ;;  %v67_v3 = vpack.c.bf16 %v66_v2, %v66_v2  ;;  %v477_v6 = vld [vmem:[#allocation4 + $0x10] sm:$0xff]   ;;  %v478_v7 = vld [vmem:[#allocation4 + $0x18] sm:$0xff]   ;;  %v479_v8 = vld [vmem:[#allocation4 + $0x20] sm:$0xff]   ;;  %v354_v37 = vand.u32 127, %v353_v36 }
  0x38   :  { %422 = vmatpush3.bf16.msra.mxu0 %v474_v1  ;;  %428 = vmatpush3.bf16.msra.mxu1 %v475_v4  ;;  %v480_v9 = vld [vmem:[#allocation4 + $0x28] sm:$0xff]   ;;  %v481_v10 = vld [vmem:[#allocation4 + $0x30] sm:$0xff]   ;;  %v482_v11 = vld [vmem:[#allocation4 + $0x38] sm:$0xff]  }
  0x39   :  { %447 = vmatprep.subr.bf16.mxu0 %v570_v0  ;;  %429 = vmatprep.subr.bf16.mxu1 %v570_v0  ;;  %v483_v12 = vld [vmem:[#allocation6] sm:$0xff]   ;;  %v484_v13 = vld [vmem:[#allocation6 + $0x8] sm:$0xff]   ;;  %v485_v14 = vld [vmem:[#allocation6 + $0x10] sm:$0xff]   ;;  %vm355_vm2 = vcmp.lt.s32.totalorder %v354_v37, 8  ;;  %vm370_vm4 = vcmp.eq.s32.totalorder %v354_v37, 8 }
  0x3a   :  { %v486_v15 = vld [vmem:[#allocation6 + $0x18] sm:$0xff]   ;;  %v487_v16 = vld [vmem:[#allocation6 + $0x20] sm:$0xff]   ;;  %v488_v17 = vld [vmem:[#allocation6 + $0x28] sm:$0xff]  }
  0x3b   :  { %424 = vmatmul.mubr.msk.bf16.vlgmr.msra.gmra.mrb[0].mxu0 %vm83_vm1, %v67_v3  ;;  %v380_v18 = vld [vmem:[%s691_s2] ss:$0 sm:$0xff]  ;;  %v490_v27 = vld [vmem:[#allocation6 + $0x38] sm:$0xff]  }
  0x3c   :  { %463 = vmatprep.mubr.msk.bf16.mxu0 %vm571_vm0, %v570_v0  ;;  %430 = vmatpush3.bf16.msra.mxu1 %v476_v5  ;;  %v489_v26 = vld [vmem:[#allocation6 + $0x30] sm:$0xff]  }
  0x3d   :  { %431 = vmatprep.subr.bf16.mxu1 %v570_v0  ;;  %448 = vmatpush3.bf16.msra.mxu0 %v483_v12  ;;  %v383_v28 = vld [vmem:[%s693_s4] ss:$0 sm:$0xff] }
  0x3e   :  { %449 = vmatprep.subr.bf16.mxu0 %v570_v0  ;;  %v392_v38 = vld [vmem:[%s695_s6] ss:$0 sm:$0xff] }
  0x40   :  { %432 = vmatpush3.bf16.msra.mxu1 %v477_v6 }
  0x41   :  { %433 = vmatprep.subr.bf16.mxu1 %v570_v0  ;;  %450 = vmatpush3.bf16.msra.mxu0 %v484_v13 }
  0x42   :  { %451 = vmatprep.subr.bf16.mxu0 %v570_v0 }
  0x44   :  { %434 = vmatpush3.bf16.msra.mxu1 %v478_v7 }
  0x45   :  { %435 = vmatprep.subr.bf16.mxu1 %v570_v0  ;;  %452 = vmatpush3.bf16.msra.mxu0 %v485_v14 }
  0x46   :  { %453 = vmatprep.subr.bf16.mxu0 %v570_v0 }
  0x48   :  { %436 = vmatpush3.bf16.msra.mxu1 %v479_v8 }
  0x49   :  { %437 = vmatprep.subr.bf16.mxu1 %v570_v0  ;;  %454 = vmatpush3.bf16.msra.mxu0 %v486_v15 }
  0x4a   :  { %455 = vmatprep.subr.bf16.mxu0 %v570_v0 }
  0x4c   :  { %438 = vmatpush3.bf16.msra.mxu1 %v480_v9 }
  0x4d   :  { %439 = vmatprep.subr.bf16.mxu1 %v570_v0  ;;  %456 = vmatpush3.bf16.msra.mxu0 %v487_v16 }
  0x4e   :  { %457 = vmatprep.subr.bf16.mxu0 %v570_v0 }
  0x50   :  { %440 = vmatpush3.bf16.msra.mxu1 %v481_v10 }
  0x51   :  { %441 = vmatprep.subr.bf16.mxu1 %v570_v0  ;;  %458 = vmatpush3.bf16.msra.mxu0 %v488_v17 }
  0x52   :  { %459 = vmatprep.subr.bf16.mxu0 %v570_v0 }
  0x54   :  { %442 = vmatpush3.bf16.msra.mxu1 %v482_v11 }
  0x55   :  { %460 = vmatpush3.bf16.msra.mxu0 %v489_v26 }
  0x56   :  { %461 = vmatprep.subr.bf16.mxu0 %v570_v0 }
  0x59   :  { %462 = vmatpush3.bf16.msra.mxu0 %v490_v27 }
 0x10e   :  { %v121_v19 = vpop.f32.mrb[0].mxu0 }
 0x10f   :  { %v122_v20 = vadd.f32 %v380_v18, %v121_v19  ;;  %v425_v21 = vpop.f32.mrb[1].mxu0 }
 0x110   :  { %v124_v22 = vpop.f32.mrb[2].mxu0 }
 0x111   :  { %v127_v23 = vmax.f32 %v122_v20, 0.0  ;;  %v426_v24 = vpop.f32.mrb[3].mxu0 }
 0x113   :  { %v128_v25 = vpack.c.bf16 %v127_v23, %v127_v23 }
 0x115   :  { %444 = vmatmul.mubr.bf16.vlgmr.msra.gmra.mrb[0].mxu1 %v128_v25 }
 0x1e8   :  { %v234_v29 = vpop.f32.mrb[0].mxu1 }
 0x1e9   :  { %v235_v30 = vadd.f32 %v383_v28, %v234_v29  ;;  %v445_v31 = vpop.f32.mrb[1].mxu1 }
 0x1ea   :  { %v237_v32 = vpop.f32.mrb[2].mxu1 }
 0x1eb   :  { %v240_v33 = vmax.f32 %v235_v30, 0.0  ;;  %v446_v34 = vpop.f32.mrb[3].mxu1 }
 0x1ed   :  { %v241_v35 = vpack.c.bf16 %v240_v33, %v240_v33 }
 0x1ef   :  { %464 = vmatmul.mubr.bf16.vlgmr.msra.gmra.mrb[4].mxu0 %v241_v35 }
 0x2c2   :  { %v347_v39 = vpop.f32.mrb[4].mxu0 }
 0x2c3   :  { %v348_v40 = vadd.f32 %v392_v38, %v347_v39  ;;  %v465_v41 = vpop.f32.mrb[5].mxu0 }
 0x2c4   :  { %v350_v42 = vpop.f32.mrb[6].mxu0 }
 0x2c5   :  { %v466_v43 = vpop.f32.mrb[7].mxu0  ;;  %v356_v44 = vsel %vm355_vm2, %v348_v40, -inf }
 0x2c6   :  { %v358_v45 = vsel %vm357_vm3, %v356_v44, -inf }
 0x2c7   :  { %359 = vmax.xlane.f32.xlu0 %v358_v45 }
 0x354   :  { %v360_v46 = vpop.xlane.xlu0 %359 }
 0x355   :  { %v361_v47 = vsub.f32 %v356_v44, %v360_v46 }
 0x357   :  { %v362_v48 = vmul.f32 1.442695, %v361_v47 }
 0x359   :  { %491 = vpow2.f32 %v362_v48 }
 0x363   :  { %v492_v49 = vpop.eup %491 }
 0x364   :  { %v364_v50 = vsel %vm355_vm2, %v492_v49, 0.0 }
 0x365   :  { %v365_v51 = vsel %vm357_vm3, %v364_v50, 0.0 }
 0x366   :  { %366 = vadd.xlane.f32.xlu0 %v365_v51 }
 0x3f3   :  { %v367_v52 = vpop.xlane.xlu0 %366 }
 0x3f4   :  { %493 = vrcp.f32 %v367_v52 }
 0x3fe   :  { %v494_v53 = vpop.eup %493 }
 0x3ff   :  { %v369_v54 = vmul.f32 %v494_v53, %v364_v50 }
 0x401   :  { %v371_v55 = vsel %vm370_vm4, %v348_v40, %v369_v54 }
 0x402   :  { %v372_v56 = vpack.c.bf16 %v371_v55, %v371_v55 }
 0x404   :  { %373 = vst [vmem:[%s696_s7] sm:$0x1] %v372_v56 }
 0x405   :  { %378 = vsyncpa [#allocation3], 1 }
 0x406   :  { %379 = vsyncpa [#allocation5], 1 }

</bundles_post_ra>
